<compile_context>
chip_gen: v6e
topology: v6e:2x2x1
jax: 0.10.0
libtpu: 0.0.40
codegen_flags: <defaults>
</compile_context>

<pallas_src>
import functools
import math

import jax
import jax.numpy as jnp
from jax.experimental import pallas as pl
from jax.experimental.pallas import tpu as pltpu


def _round_up(x: int, m: int) -> int:
    return ((x + m - 1) // m) * m


# ---------------------------------------------------------------------------
# Path 1: resident table + one-hot gather on the MXU.
# ---------------------------------------------------------------------------
def _embedding_onehot_kernel(ids_ref, w_ref, o_ref, *, scale):
    """o = one_hot(ids) @ W * sqrt(D).

    ids_ref : VMEM (tile, 1) int32   -- token ids for this tile (column vector)
    w_ref   : VMEM (V, D)            -- whole embedding table (constant block)
    o_ref   : VMEM (tile, D)         -- output block
    """
    ids = ids_ref[...]                                       # (tile, 1)
    tile = ids.shape[0]
    V = w_ref.shape[0]
    pos = jax.lax.broadcasted_iota(jnp.int32, (tile, V), 1)  # lane axis = vocab
    one_hot = (pos == ids).astype(w_ref.dtype)               # exact gather matrix
    acc = jnp.dot(one_hot, w_ref[...], preferred_element_type=jnp.float32)
    o_ref[...] = (acc * scale).astype(o_ref.dtype)


# ---------------------------------------------------------------------------
# Path 2: manual DMA gather, double-buffered, for huge vocabularies.
# ---------------------------------------------------------------------------
def _embedding_dma_kernel(ids_ref, w_hbm, o_ref, buf, sems, *, tile, scale):
    """Gather `tile` embedding rows for this grid step, scale, and store.

    ids_ref : SMEM (n_pad,) int32    -- scalar-prefetched token ids
    w_hbm   : HBM  (V, D)            -- embedding table (memory_space=pl.ANY)
    o_ref   : VMEM (tile, D)         -- output block
    buf     : VMEM (2, tile, D)      -- double-buffered gathered rows
    sems    : DMA semaphores (2,)    -- one per slot (all row copies of a slot share it)
    """
    t = pl.program_id(0)
    nt = pl.num_programs(0)
    slot = t % 2

    def issue(tile_idx, slot_idx):
        base = tile_idx * tile

        @pl.loop(0, tile)
        def _(i):
            row = ids_ref[base + i]
            pltpu.make_async_copy(
                w_hbm.at[row], buf.at[slot_idx, i], sems.at[slot_idx]
            ).start()

    # Prime the pipeline with the first tile's rows.
    @pl.when(t == 0)
    def _():
        issue(0, 0)

    # Prefetch next tile's rows into the other slot while we consume this one.
    @pl.when(t + 1 < nt)
    def _():
        issue(t + 1, 1 - slot)

    # Aggregate wait: every row copy of this slot signals sems[slot] with D*itemsize
    # bytes; a single descriptor sized as the whole slot (tile*D*itemsize bytes)
    # drains them all in one scalar-path wait instead of `tile` waits.
    pltpu.make_async_copy(
        w_hbm.at[pl.ds(0, tile)], buf.at[slot], sems.at[slot]
    ).wait()

    # Fused embedding scale (upcast first so bf16 tables are exact on v5e too).
    o_ref[...] = (buf[slot].astype(jnp.float32) * scale).astype(o_ref.dtype)


# ---------------------------------------------------------------------------
# Wrapper.
# ---------------------------------------------------------------------------
def embedding_lookup(ids, weight, *, tile=None, force_dma_path=False):
    """out[..., :] = weight[ids[...], :] * sqrt(embed_dim)."""
    V, D = weight.shape
    orig_shape = ids.shape
    flat = ids.reshape(-1).astype(jnp.int32)
    n = flat.shape[0]
    scale = float(math.sqrt(D))

    if n == 0:  # degenerate input: nothing to gather
        return jnp.zeros((*orig_shape, D), weight.dtype)

    # Clamp out-of-range ids so a bad id can never fault a DMA / read garbage.
    flat = jnp.clip(flat, 0, V - 1)

    itemsize = jnp.dtype(weight.dtype).itemsize
    table_bytes = V * D * itemsize
    # Resident path gate: table (double-buffered) + one-hot intermediate must stay
    # comfortably inside v7x's smaller VMEM; otherwise use the HBM DMA gather.
    use_resident = (
        (not force_dma_path) and table_bytes <= 4 * 1024 * 1024 and V <= 2048
    )

    if tile is None:
        tile = 256 if n >= 256 else _round_up(n, 8)

    if use_resident:
        n_pad = _round_up(n, tile)
        if n_pad != n:
            flat = jnp.concatenate([flat, jnp.zeros((n_pad - n,), jnp.int32)])
        ids2d = flat.reshape(n_pad, 1)

        kernel = functools.partial(_embedding_onehot_kernel, scale=scale)
        out = pl.pallas_call(
            kernel,
            out_shape=jax.ShapeDtypeStruct((n_pad, D), weight.dtype),
            grid_spec=pltpu.PrefetchScalarGridSpec(
                num_scalar_prefetch=0,
                grid=(n_pad // tile,),
                in_specs=[
                    pl.BlockSpec((tile, 1), lambda t: (t, 0)),  # ids column
                    pl.BlockSpec((V, D), lambda t: (0, 0)),     # whole table, reused
                ],
                out_specs=pl.BlockSpec((tile, D), lambda t: (t, 0)),
            ),
            compiler_params=pltpu.CompilerParams(
                dimension_semantics=("parallel",),              # both TCs on v7x
                vmem_limit_bytes=32 * 1024 * 1024,
            ),
        )(ids2d, weight)
        return out[:n].reshape(*orig_shape, D)

    # ----- large-vocab DMA gather path -----
    # Keep tile <= V (the aggregate-wait descriptor slices tile rows of the table).
    if V >= 8:
        tile = max(8, min(tile, (V // 8) * 8))
    n_pad = _round_up(n, tile)
    if n_pad != n:
        flat = jnp.concatenate([flat, jnp.zeros((n_pad - n,), jnp.int32)])

    kernel = functools.partial(_embedding_dma_kernel, tile=tile, scale=scale)
    out = pl.pallas_call(
        kernel,
        out_shape=jax.ShapeDtypeStruct((n_pad, D), weight.dtype),
        grid_spec=pltpu.PrefetchScalarGridSpec(
            num_scalar_prefetch=1,                         # flat ids -> SMEM
            grid=(n_pad // tile,),
            in_specs=[pl.BlockSpec(memory_space=pl.ANY)],  # table stays in HBM
            out_specs=pl.BlockSpec((tile, D), lambda t, ids_smem: (t, 0)),
            scratch_shapes=[
                pltpu.VMEM((2, tile, D), weight.dtype),    # double-buffered rows
                pltpu.SemaphoreType.DMA((2,)),             # one semaphore per slot
            ],
        ),
        compiler_params=pltpu.CompilerParams(
            # Cross-step prefetch relies on sequential grid order.
            dimension_semantics=("arbitrary",),
        ),
    )(flat, weight)
    return out[:n].reshape(*orig_shape, D)


class EmbeddingLayer:
    """JAX/Pallas mirror of the PyTorch EmbeddingLayer."""

    def __init__(self, vocab_size: int, embed_dim: int, pad_id: int = 0, *, key):
        w = jax.random.normal(key, (vocab_size, embed_dim), dtype=jnp.float32)
        w = w.at[pad_id].set(0.0)  # nn.Embedding(padding_idx=pad_id) zeroes this row
        self.weight = w
        self.embed_dim = embed_dim
        self.pad_id = pad_id

    def __call__(self, x: jax.Array) -> jax.Array:
        # (The PyTorch forward also calls print(x) for debugging; intentionally omitted.)
        return embedding_lookup(x, self.weight)


if __name__ == "__main__":
    vocab_size, embed_dim, pad_id = 256, 128, 0
    batch, seq_len = 2, 8

    root = jax.random.PRNGKey(0)
    k_w, k_ids = jax.random.split(root)

    layer = EmbeddingLayer(vocab_size, embed_dim, pad_id, key=k_w)

    x = jax.random.randint(k_ids, (batch, seq_len), 0, vocab_size, dtype=jnp.int32)
    x = x.at[0, 0].set(pad_id)  # exercise the zeroed padding row

    # Pure-JAX reference of the PyTorch forward.
    ref = layer.weight[x] * math.sqrt(embed_dim)

    # Path 1: resident-table / one-hot MXU gather (default for this table size).
    out = jax.block_until_ready(layer(x))
    assert out.shape == (batch, seq_len, embed_dim), out.shape
    assert out.dtype == jnp.float32, out.dtype
    assert jnp.allclose(out, ref, atol=1e-5, rtol=1e-5), "resident path mismatch"
    assert jnp.allclose(out[0, 0], 0.0), "padding row must stay zero"

    # Path 2: large-vocab DMA-gather path (forced, small tile to exercise the
    # double-buffered multi-step pipeline and the aggregate semaphore wait).
    out_dma = jax.block_until_ready(
        embedding_lookup(x, layer.weight, tile=8, force_dma_path=True)
    )
    assert jnp.allclose(out_dma, ref, atol=1e-5, rtol=1e-5), "DMA path mismatch"

    print("KERNEL_OK")
</pallas_src>

<mosaic_0001>
module attributes {stable_mosaic.version = 11 : i64} {
  func.func @_embedding_onehot_kernel(%arg0: i32, %arg1: memref<16x1xi32, #tpu.memory_space<vmem>>, %arg2: memref<256x128xf32, #tpu.memory_space<vmem>>, %arg3: memref<16x128xf32, #tpu.memory_space<vmem>>) attributes {dimension_semantics = [#tpu.dimension_semantics<parallel>], iteration_bounds = array<i64: 1>, scalar_prefetch = 0 : i64, scratch_operands = 0 : i64, tpu.core_type = #tpu.core_type<tc>, window_params = [{transform_indices = @transform_0, window_bounds = array<i64: 16, 1>}, {pipeline_mode = #tpu.pipeline_mode<synchronous>, transform_indices = @transform_1, window_bounds = array<i64: 256, 128>}, {transform_indices = @transform_2, window_bounds = array<i64: 16, 128>}]} {
    %c0 = arith.constant 0 : index
    %c0_0 = arith.constant 0 : index
    %0 = vector.load %arg1[%c0, %c0_0] : memref<16x1xi32, #tpu.memory_space<vmem>>, vector<16x1xi32>
    %1 = tpu.iota {dimensions = array<i32: 1>} : vector<16x256xi32>
    %2 = vector.broadcast %0 : vector<16x1xi32> to vector<16x256xi32>
    %3 = arith.cmpi eq, %1, %2 : vector<16x256xi32>
    %4 = arith.extui %3 : vector<16x256xi1> to vector<16x256xi32>
    %5 = arith.sitofp %4 : vector<16x256xi32> to vector<16x256xf32>
    %c0_1 = arith.constant 0 : index
    %c0_2 = arith.constant 0 : index
    %6 = vector.load %arg2[%c0_1, %c0_2] : memref<256x128xf32, #tpu.memory_space<vmem>>, vector<256x128xf32>
    %cst = arith.constant dense<0.000000e+00> : vector<16x128xf32>
    %7 = tpu.matmul %5, %6, %cst {dimension_numbers = #tpu.dot_dimension_numbers<[1], [0], [0], [1], [0, 0, 1, 1], [], []>} : vector<16x256xf32>, vector<256x128xf32>, vector<16x128xf32> -> vector<16x128xf32>
    %cst_3 = arith.constant 11.3137083 : f32
    %8 = vector.broadcast %cst_3 : f32 to vector<16x128xf32>
    %9 = arith.mulf %7, %8 : vector<16x128xf32>
    %c0_4 = arith.constant 0 : index
    %c0_5 = arith.constant 0 : index
    %10 = vector.load %arg3[%c0_4, %c0_5] : memref<16x128xf32, #tpu.memory_space<vmem>>, vector<16x128xf32>
    tpu.vector_store %arg3[%c0_4, %c0_5], %9 {strides = array<i32>} : memref<16x128xf32, #tpu.memory_space<vmem>>, vector<16x128xf32>,
    return
  }
  func.func @transform_0(%arg0: i32) -> (i32, i32) {
    %c0_i32 = arith.constant 0 : i32
    %c0_i32_0 = arith.constant 0 : i32
    return %arg0, %c0_i32 : i32, i32
  }
  func.func @transform_1(%arg0: i32) -> (i32, i32) {
    %c0_i32 = arith.constant 0 : i32
    %c0_i32_0 = arith.constant 0 : i32
    %c0_i32_1 = arith.constant 0 : i32
    return %c0_i32, %c0_i32_0 : i32, i32
  }
  func.func @transform_2(%arg0: i32) -> (i32, i32) {
    %c0_i32 = arith.constant 0 : i32
    %c0_i32_0 = arith.constant 0 : i32
    return %arg0, %c0_i32 : i32, i32
  }
}

</mosaic_0001>

<bundles_post_ra>
// kernel: tpu_custom_call.1
= control target key start
LH: loop header
LB: loop body
LE: loop exit
PB: predicated region body
PF: predicated region fallthrough
CT: control target
= control target key end

     0   :  { %7 = vsyncpa [#allocation3], 0  ;;  %s345_s0 = inlined_call_operand.vmem [shape: s32[16,1], index: 0, kind: input, shape index: {}]   ;;  %s346_s1 = inlined_call_operand.hbm [shape: f32[256,128], index: 1, kind: input, shape index: {}]   ;;  %s347_s2 = inlined_call_operand.hbm [shape: f32[16,128], index: 2, kind: output, shape index: {}]  }
   0x1   :  { %8 = vsyncpa [#allocation4], 0  ;;  %s306_s9 = smov [#allocation2]  }
   0x2   :  { %s16_s10 = sshll.u32 %s306_s9, 4  ;;  %s17_s10 = int_to_ptr.vmem [resolvable:$true] %s16_s10 }
   0x3   :  { %s270_s11 = scalar_lea.vmem %s17_s10, 4096  ;;  %p275_p1 = scmp.lt.s32.totalorder %s17_s10, %s17_s10 }
   0x4   :  { %p271_p0 = scmp.ne.s32.totalorder %s17_s10, %s270_s11  ;;  %p276_p2 = scmp.lt.s32.totalorder %s270_s11, %s270_s11 }
   0x6   :  { %p277_p3 = por %p276_p2, %p275_p1 }
   0x8   :  { %p278_p4 = pnand %p277_p3, %p271_p0 }
   0xa   :  { %281 = shalt.err (!%p278_p4)
}
   0xb   :  { %s307_s12 = smov 128   ;;  %s308_s13 = smov 8  }
   0xc   :  { %22 = dma.hbm_to_vmem [thread:$0]  %s346_s1, 4096, %s17_s10, [#allocation3], %s307_s12, %s307_s12, %s308_s13  }
   0xd   :  { %302 = dma.done.wait [#allocation3], 4096  }
   0xe   :  { %303 = vsyncadd [#allocation3], 4294963200  ;;  %v309_v0 = vmov 0   ;;  %v26_v1 = vld [vmem:[%s345_s0] sm:$0xff]  ;;  %v80_v2 = vld [vmem:[#allocation2 + $0xf8] sm:$0xff]  ;;  %v28_v35 = vlaneseq  ;;  %v310_v39 = vmov 1.0  }
   0xf   :  { %261 = vset.pattern.permute.xlu0 %v309_v0  ;;  %185 = vmatprep.subr.mxu0 %v80_v2  ;;  %v64_v3 = vld [vmem:[#allocation2 + $0x78] sm:$0xff]  ;;  %v79_v4 = vld [vmem:[#allocation2 + $0xf0] sm:$0xff]  ;;  %v27_v6 = vld [vmem:[%s345_s0 + $0x8] sm:$0xff]  ;;  %s311_s0 = smov [#allocation5]  }
  0x10   :  { %32 = vperm.xlu0 %261, %v26_v1   ;;  %v63_v5 = vld [vmem:[#allocation2 + $0x70] sm:$0xff]  ;;  %186 = vmatpush3.msra.mxu0 %v64_v3  ;;  %v78_v7 = vld [vmem:[#allocation2 + $0xe8] sm:$0xff]  ;;  %v77_v9 = vld [vmem:[#allocation2 + $0xe0] sm:$0xff]  ;;  %v29_v36 = vand.u32 127, %v28_v35  ;;  %s165_s1 = sshll.u32 %s311_s0, 4  ;;  %s166_s1 = int_to_ptr.vmem [resolvable:$true] %s165_s1 }
  0x11   :  { %223 = vmatprep.subr.mxu1 %v80_v2  ;;  %187 = vmatprep.subr.mxu0 %v79_v4  ;;  %v62_v8 = vld [vmem:[#allocation2 + $0x68] sm:$0xff]  ;;  %v61_v10 = vld [vmem:[#allocation2 + $0x60] sm:$0xff]  ;;  %v76_v11 = vld [vmem:[#allocation2 + $0xd8] sm:$0xff]  ;;  %s282_s20 = scalar_lea.vmem %s166_s1, 256  ;;  %p287_p6 = scmp.lt.s32.totalorder %s166_s1, %s166_s1 }
  0x12   :  { %239 = vmatpush3.msra.mxu1 %v64_v3  ;;  %188 = vmatpush3.msra.mxu0 %v63_v5  ;;  %v60_v12 = vld [vmem:[#allocation2 + $0x58] sm:$0xff]  ;;  %v75_v13 = vld [vmem:[#allocation2 + $0xd0] sm:$0xff]  ;;  %v74_v15 = vld [vmem:[#allocation2 + $0xc8] sm:$0xff]  ;;  %v30_v37 = vadd.s32 128, %v29_v36  ;;  %p283_p5 = scmp.ne.s32.totalorder %s166_s1, %s282_s20  ;;  %p288_p7 = scmp.lt.s32.totalorder %s282_s20, %s282_s20 }
  0x13   :  { %224 = vmatprep.subr.mxu1 %v79_v4  ;;  %189 = vmatprep.subr.mxu0 %v78_v7  ;;  %v59_v14 = vld [vmem:[#allocation2 + $0x50] sm:$0xff]  ;;  %v58_v16 = vld [vmem:[#allocation2 + $0x48] sm:$0xff]  ;;  %v73_v17 = vld [vmem:[#allocation2 + $0xc0] sm:$0xff] }
  0x14   :  { %35 = vperm.xlu0 %261, %v27_v6   ;;  %190 = vmatpush3.msra.mxu0 %v62_v8  ;;  %v57_v18 = vld [vmem:[#allocation2 + $0x40] sm:$0xff]  ;;  %v72_v19 = vld [vmem:[#allocation2 + $0xb8] sm:$0xff]  ;;  %v71_v21 = vld [vmem:[#allocation2 + $0xb0] sm:$0xff]  ;;  %p289_p8 = por %p288_p7, %p287_p6 }
  0x15   :  { %240 = vmatpush3.msra.mxu1 %v63_v5  ;;  %191 = vmatprep.subr.mxu0 %v77_v9  ;;  %v56_v20 = vld [vmem:[#allocation2 + $0x38] sm:$0xff]  ;;  %v55_v22 = vld [vmem:[#allocation2 + $0x30] sm:$0xff]  ;;  %v70_v23 = vld [vmem:[#allocation2 + $0xa8] sm:$0xff] }
  0x16   :  { %225 = vmatprep.subr.mxu1 %v78_v7  ;;  %192 = vmatpush3.msra.mxu0 %v61_v10  ;;  %v54_v24 = vld [vmem:[#allocation2 + $0x28] sm:$0xff]  ;;  %v69_v25 = vld [vmem:[#allocation2 + $0xa0] sm:$0xff]  ;;  %v68_v27 = vld [vmem:[#allocation2 + $0x98] sm:$0xff]  ;;  %p290_p9 = pnand %p289_p8, %p283_p5 }
  0x17   :  { %241 = vmatpush3.msra.mxu1 %v62_v8  ;;  %193 = vmatprep.subr.mxu0 %v76_v11  ;;  %v53_v26 = vld [vmem:[#allocation2 + $0x20] sm:$0xff]  ;;  %v52_v28 = vld [vmem:[#allocation2 + $0x18] sm:$0xff]  ;;  %v67_v29 = vld [vmem:[#allocation2 + $0x90] sm:$0xff] }
  0x18   :  { %226 = vmatprep.subr.mxu1 %v77_v9  ;;  %194 = vmatpush3.msra.mxu0 %v60_v12  ;;  %v51_v30 = vld [vmem:[#allocation2 + $0x10] sm:$0xff]  ;;  %v66_v31 = vld [vmem:[#allocation2 + $0x88] sm:$0xff]  ;;  %v65_v33 = vld [vmem:[#allocation2 + $0x80] sm:$0xff] }
  0x19   :  { %242 = vmatpush3.msra.mxu1 %v61_v10  ;;  %195 = vmatprep.subr.mxu0 %v75_v13  ;;  %v50_v32 = vld [vmem:[#allocation2 + $0x8] sm:$0xff]  ;;  %v49_v34 = vld [vmem:[#allocation2] sm:$0xff] }
  0x1a   :  { %227 = vmatprep.subr.mxu1 %v76_v11  ;;  %196 = vmatpush3.msra.mxu0 %v59_v14 }
  0x1b   :  { %243 = vmatpush3.msra.mxu1 %v60_v12  ;;  %197 = vmatprep.subr.mxu0 %v74_v15 }
  0x1c   :  { %228 = vmatprep.subr.mxu1 %v75_v13  ;;  %198 = vmatpush3.msra.mxu0 %v58_v16 }
  0x1d   :  { %244 = vmatpush3.msra.mxu1 %v59_v14  ;;  %199 = vmatprep.subr.mxu0 %v73_v17 }
  0x1e   :  { %229 = vmatprep.subr.mxu1 %v74_v15  ;;  %200 = vmatpush3.msra.mxu0 %v57_v18 }
  0x1f   :  { %245 = vmatpush3.msra.mxu1 %v58_v16  ;;  %201 = vmatprep.subr.mxu0 %v72_v19 }
  0x20   :  { %230 = vmatprep.subr.mxu1 %v73_v17  ;;  %202 = vmatpush3.msra.mxu0 %v56_v20 }
  0x21   :  { %246 = vmatpush3.msra.mxu1 %v57_v18  ;;  %203 = vmatprep.subr.mxu0 %v71_v21 }
  0x22   :  { %231 = vmatprep.subr.mxu1 %v72_v19  ;;  %204 = vmatpush3.msra.mxu0 %v55_v22 }
  0x23   :  { %247 = vmatpush3.msra.mxu1 %v56_v20  ;;  %205 = vmatprep.subr.mxu0 %v70_v23 }
  0x24   :  { %232 = vmatprep.subr.mxu1 %v71_v21  ;;  %206 = vmatpush3.msra.mxu0 %v54_v24 }
  0x25   :  { %248 = vmatpush3.msra.mxu1 %v55_v22  ;;  %207 = vmatprep.subr.mxu0 %v69_v25 }
  0x26   :  { %233 = vmatprep.subr.mxu1 %v70_v23  ;;  %208 = vmatpush3.msra.mxu0 %v53_v26 }
  0x27   :  { %249 = vmatpush3.msra.mxu1 %v54_v24  ;;  %209 = vmatprep.subr.mxu0 %v68_v27 }
  0x28   :  { %234 = vmatprep.subr.mxu1 %v69_v25  ;;  %210 = vmatpush3.msra.mxu0 %v52_v28 }
  0x29   :  { %250 = vmatpush3.msra.mxu1 %v53_v26  ;;  %211 = vmatprep.subr.mxu0 %v67_v29 }
  0x2a   :  { %235 = vmatprep.subr.mxu1 %v68_v27  ;;  %212 = vmatpush3.msra.mxu0 %v51_v30 }
  0x2b   :  { %251 = vmatpush3.msra.mxu1 %v52_v28  ;;  %213 = vmatprep.subr.mxu0 %v66_v31 }
  0x2c   :  { %236 = vmatprep.subr.mxu1 %v67_v29  ;;  %214 = vmatpush3.msra.mxu0 %v50_v32 }
  0x2d   :  { %252 = vmatpush3.msra.mxu1 %v51_v30  ;;  %215 = vmatprep.subr.mxu0 %v65_v33 }
  0x2e   :  { %237 = vmatprep.subr.mxu1 %v66_v31  ;;  %216 = vmatpush3.msra.mxu0 %v49_v34 }
  0x2f   :  { %253 = vmatpush3.msra.mxu1 %v50_v32 }
  0x30   :  { %238 = vmatprep.subr.mxu1 %v65_v33 }
  0x31   :  { %254 = vmatpush3.msra.mxu1 %v49_v34 }
  0x8b   :  { %v33_v38 = vpop.permute.xlu0 %32 }
  0x8c   :  { %vm37_vm0 = vcmp.eq.s32.totalorder %v29_v36, %v33_v38  ;;  %vm38_vm1 = vcmp.eq.s32.totalorder %v30_v37, %v33_v38 }
  0x8d   :  { %181 = vmatprep.mubr.msk.f32.mxu0 %vm38_vm1, %v310_v39 }
  0x8e   :  { %182 = vmatmul.mubr.msk.f32.vlgmr.msra.gmra.mxu0 %vm37_vm0, %v310_v39 }
  0x8f   :  { %v36_v40 = vpop.permute.xlu0 %35 }
  0x90   :  { %vm39_vm2 = vcmp.eq.s32.totalorder %v29_v36, %v36_v40  ;;  %vm40_vm3 = vcmp.eq.s32.totalorder %v30_v37, %v36_v40 }
  0x91   :  { %183 = vmatprep.mubr.msk.f32.mxu1 %vm40_vm3, %v310_v39 }
  0x92   :  { %184 = vmatmul.mubr.msk.f32.vlgmr.msra.gmra.mxu1 %vm39_vm2, %v310_v39 }
 0x14e   :  { %v217_v41 = vpop.f32.mrf.mxu0 }
 0x150   :  { %v218_v42 = vpop.f32.mrf.mxu0 }
 0x151   :  { %v219_v43 = vadd.f32 %v218_v42, %v217_v41 }
 0x152   :  { %v220_v44 = vpop.f32.mrf.mxu1 }
 0x153   :  { %v156_v45 = vmul.f32 11.313708, %v219_v43 }
 0x154   :  { %v221_v46 = vpop.f32.mrf.mxu1 }
 0x155   :  { %158 = vst [vmem:[#allocation5] sm:$0xff] %v156_v45  ;;  %v222_v47 = vadd.f32 %v221_v46, %v220_v44 }
 0x157   :  { %v157_v48 = vmul.f32 11.313708, %v222_v47 }
 0x159   :  { %159 = vst [vmem:[#allocation5 + $0x8] sm:$0xff] %v157_v48 }
 0x15a   :  { %293 = shalt.err (!%p290_p9)
}
 0x15b   :  { %171 = dma.vmem_to_hbm [thread:$0]  %s166_s1, 256, %s347_s2, [#allocation4], %s307_s12, %s307_s12, %s308_s13  }
 0x15c   :  { %304 = dma.done.wait [#allocation4], 256  }
 0x15d   :  { %305 = vsyncadd [#allocation4], 4294967040 }
 0x15e   :  { %175 = vsyncpa [#allocation3], 1 }
 0x15f   :  { %176 = vsyncpa [#allocation4], 1 }

</bundles_post_ra>
